<compile_context>
chip_gen: v7x
topology: tpu7x:2x2x1
jax: 0.10.0
libtpu: 0.0.40
codegen_flags: <defaults>
</compile_context>

<pallas_src>
import jax
import jax.numpy as jnp
from jax.experimental import pallas as pl
from jax.experimental.pallas import tpu as pltpu


def _sigmoid(z):
    # sigmoid(z) = 0.5 * tanh(z/2) + 0.5 : single EUP op, no overflow clamp.
    return 0.5 * jnp.tanh(0.5 * z) + 0.5


def xornet_kernel(x_ref, out_ref):
    # x_ref: (2, ROWS, 128) -- feature axis leading, batch dense on (sublane, lane).
    x0 = x_ref[0].astype(jnp.float32)          # (ROWS, 128)
    x1 = x_ref[1].astype(jnp.float32)          # (ROWS, 128)
    s = x0 + x1

    # Layers a & b (== torch.cat([act_or, act_nand], dim=1)) fused elementwise.
    y_or = _sigmoid(100.0 * s - 50.0)          # a: W=[100, 100],  b=-50
    y_nand = _sigmoid(150.0 - 100.0 * s)       # b: W=[-100,-100], b=150

    # Layer c: W=[100, 100], b=-150, then final sigmoid.
    out_ref[...] = _sigmoid(100.0 * (y_or + y_nand) - 150.0).astype(out_ref.dtype)


def _round_up(a, m):
    return (a + m - 1) // m * m


def _choose_tiling(n, dtype, rows_max=2048):
    """Pick (rows, grid, padded_rows): blocks ~2 MiB of input, padding <~1%,
    and >=2 grid steps whenever there is enough work (v7x megacore)."""
    granule = max(8, 32 // jnp.dtype(dtype).itemsize)   # sublane packing granule
    nb = pl.cdiv(n, 128)                                # 128-wide batch rows
    grid = max(pl.cdiv(nb, rows_max), 2 if nb >= 2 * granule else 1)
    rows = _round_up(pl.cdiv(nb, grid), granule)
    return rows, grid, rows * grid


def xornet_forward(x, *, rows_max=2048, out_dtype=jnp.float32):
    """XORNet forward. x: (N, 2) (PyTorch layout) or (2, N) feature-major.
    Returns (N, 1) in `out_dtype` (pass jnp.bfloat16 to halve output HBM bytes;
    compute stays f32 inside the kernel)."""
    if x.ndim == 2 and x.shape[-1] == 2:
        # PyTorch layout: one extra HBM pass for the transpose.  Pass a (2, N)
        # feature-major array instead to avoid it entirely.
        # TODO(synk): fold the (N,2)->(2,N) de-interleave into the kernel via a
        # strided-lane pick so the natural layout also avoids this pass.
        n = x.shape[0]
        xt = x.T
    elif x.ndim == 2 and x.shape[0] == 2:
        n = x.shape[1]
        xt = x
    else:
        raise ValueError(f"expected (N, 2) or (2, N) input, got {x.shape}")

    rows, grid, nb_pad = _choose_tiling(n, x.dtype, rows_max)
    padded_n = nb_pad * 128
    if padded_n != n:
        xt = jnp.pad(xt, ((0, 0), (0, padded_n - n)))
    x3 = xt.reshape(2, nb_pad, 128)                     # contiguous -> free view

    out = pl.pallas_call(
        xornet_kernel,
        out_shape=jax.ShapeDtypeStruct((nb_pad, 128), out_dtype),
        grid=(grid,),
        in_specs=[pl.BlockSpec((2, rows, 128), lambda i: (0, i, 0))],
        out_specs=pl.BlockSpec((rows, 128), lambda i: (i, 0)),
        compiler_params=pltpu.CompilerParams(
            dimension_semantics=("parallel",)),
    )(x3)

    out = out.reshape(padded_n, 1)
    return out if padded_n == n else out[:n]


def reference_forward(x):
    # Pure-JAX reference with the exact XORNet parameters.
    w1 = jnp.array([[100.0, -100.0],
                    [100.0, -100.0]], dtype=jnp.float32)   # cols = [a, b]
    b1 = jnp.array([-50.0, 150.0], dtype=jnp.float32)
    w2 = jnp.array([[100.0],
                    [100.0]], dtype=jnp.float32)
    b2 = jnp.array([-150.0], dtype=jnp.float32)
    y = jax.nn.sigmoid(x @ w1 + b1)
    return jax.nn.sigmoid(y @ w2 + b2)


if __name__ == "__main__":
    key = jax.random.PRNGKey(0)
    # Small batch of XOR-style binary inputs, shape (8, 2).
    x = jax.random.bernoulli(key, 0.5, (8, 2)).astype(jnp.float32)

    out = jax.block_until_ready(xornet_forward(x))
    ref = reference_forward(x)

    assert out.shape == (8, 1), out.shape
    assert jnp.allclose(out, ref, atol=1e-4), (out, ref)

    print("KERNEL_OK")
</pallas_src>

<mosaic_0001>
module attributes {stable_mosaic.version = 11 : i64} {
  func.func @xornet_kernel(%arg0: i32, %arg1: memref<2x8x128xf32, #tpu.memory_space<vmem>>, %arg2: memref<8x128xf32, #tpu.memory_space<vmem>>) attributes {dimension_semantics = [#tpu.dimension_semantics<parallel>], iteration_bounds = array<i64: 1>, scalar_prefetch = 0 : i64, scratch_operands = 0 : i64, tpu.core_type = #tpu.core_type<tc>, window_params = [{transform_indices = @transform_0, window_bounds = array<i64: 2, 8, 128>}, {transform_indices = @transform_1, window_bounds = array<i64: 8, 128>}]} {
    %c0 = arith.constant 0 : index
    %c0_0 = arith.constant 0 : index
    %c0_1 = arith.constant 0 : index
    %0 = vector.load %arg1[%c0, %c0_0, %c0_1] : memref<2x8x128xf32, #tpu.memory_space<vmem>>, vector<1x8x128xf32>
    %1 = vector.shape_cast %0 : vector<1x8x128xf32> to vector<8x128xf32>
    %c1 = arith.constant 1 : index
    %c0_2 = arith.constant 0 : index
    %c0_3 = arith.constant 0 : index
    %2 = vector.load %arg1[%c1, %c0_2, %c0_3] : memref<2x8x128xf32, #tpu.memory_space<vmem>>, vector<1x8x128xf32>
    %3 = vector.shape_cast %2 : vector<1x8x128xf32> to vector<8x128xf32>
    %4 = arith.addf %1, %3 : vector<8x128xf32>
    %cst = arith.constant 1.000000e+02 : f32
    %5 = vector.broadcast %cst : f32 to vector<8x128xf32>
    %6 = arith.mulf %5, %4 : vector<8x128xf32>
    %cst_4 = arith.constant 5.000000e+01 : f32
    %7 = vector.broadcast %cst_4 : f32 to vector<8x128xf32>
    %8 = arith.subf %6, %7 : vector<8x128xf32>
    %cst_5 = arith.constant 5.000000e-01 : f32
    %9 = vector.broadcast %cst_5 : f32 to vector<8x128xf32>
    %10 = arith.mulf %9, %8 : vector<8x128xf32>
    %11 = math.tanh %10 : vector<8x128xf32>
    %cst_6 = arith.constant 5.000000e-01 : f32
    %12 = vector.broadcast %cst_6 : f32 to vector<8x128xf32>
    %13 = arith.mulf %12, %11 : vector<8x128xf32>
    %cst_7 = arith.constant 5.000000e-01 : f32
    %14 = vector.broadcast %cst_7 : f32 to vector<8x128xf32>
    %15 = arith.addf %13, %14 : vector<8x128xf32>
    %cst_8 = arith.constant 1.000000e+02 : f32
    %16 = vector.broadcast %cst_8 : f32 to vector<8x128xf32>
    %17 = arith.mulf %16, %4 : vector<8x128xf32>
    %cst_9 = arith.constant 1.500000e+02 : f32
    %18 = vector.broadcast %cst_9 : f32 to vector<8x128xf32>
    %19 = arith.subf %18, %17 : vector<8x128xf32>
    %cst_10 = arith.constant 5.000000e-01 : f32
    %20 = vector.broadcast %cst_10 : f32 to vector<8x128xf32>
    %21 = arith.mulf %20, %19 : vector<8x128xf32>
    %22 = math.tanh %21 : vector<8x128xf32>
    %cst_11 = arith.constant 5.000000e-01 : f32
    %23 = vector.broadcast %cst_11 : f32 to vector<8x128xf32>
    %24 = arith.mulf %23, %22 : vector<8x128xf32>
    %cst_12 = arith.constant 5.000000e-01 : f32
    %25 = vector.broadcast %cst_12 : f32 to vector<8x128xf32>
    %26 = arith.addf %24, %25 : vector<8x128xf32>
    %27 = arith.addf %15, %26 : vector<8x128xf32>
    %cst_13 = arith.constant 1.000000e+02 : f32
    %28 = vector.broadcast %cst_13 : f32 to vector<8x128xf32>
    %29 = arith.mulf %28, %27 : vector<8x128xf32>
    %cst_14 = arith.constant 1.500000e+02 : f32
    %30 = vector.broadcast %cst_14 : f32 to vector<8x128xf32>
    %31 = arith.subf %29, %30 : vector<8x128xf32>
    %cst_15 = arith.constant 5.000000e-01 : f32
    %32 = vector.broadcast %cst_15 : f32 to vector<8x128xf32>
    %33 = arith.mulf %32, %31 : vector<8x128xf32>
    %34 = math.tanh %33 : vector<8x128xf32>
    %cst_16 = arith.constant 5.000000e-01 : f32
    %35 = vector.broadcast %cst_16 : f32 to vector<8x128xf32>
    %36 = arith.mulf %35, %34 : vector<8x128xf32>
    %cst_17 = arith.constant 5.000000e-01 : f32
    %37 = vector.broadcast %cst_17 : f32 to vector<8x128xf32>
    %38 = arith.addf %36, %37 : vector<8x128xf32>
    %c0_18 = arith.constant 0 : index
    %c0_19 = arith.constant 0 : index
    %39 = vector.load %arg2[%c0_18, %c0_19] : memref<8x128xf32, #tpu.memory_space<vmem>>, vector<8x128xf32>
    tpu.vector_store %arg2[%c0_18, %c0_19], %38 {strides = array<i32>} : memref<8x128xf32, #tpu.memory_space<vmem>>, vector<8x128xf32>,
    return
  }
  func.func @transform_0(%arg0: i32) -> (i32, i32, i32) {
    %c0_i32 = arith.constant 0 : i32
    %c0_i32_0 = arith.constant 0 : i32
    %c0_i32_1 = arith.constant 0 : i32
    return %c0_i32, %arg0, %c0_i32_0 : i32, i32, i32
  }
  func.func @transform_1(%arg0: i32) -> (i32, i32) {
    %c0_i32 = arith.constant 0 : i32
    %c0_i32_0 = arith.constant 0 : i32
    return %arg0, %c0_i32 : i32, i32
  }
}

</mosaic_0001>

<bundles_post_ra>
// kernel: tpu_custom_call.1
= control target key start
LH: loop header
LB: loop body
LE: loop exit
PB: predicated region body
PF: predicated region fallthrough
CT: control target
= control target key end

     0   :  { %6 = vsyncpa [#allocation3], 0  ;;  %s159_s0 = inlined_call_operand.hbm [shape: f32[2,8,128], index: 0, kind: input, shape index: {}]   ;;  %s160_s1 = inlined_call_operand.hbm [shape: f32[8,128], index: 1, kind: output, shape index: {}]  }
   0x1   :  { %7 = vsyncpa [#allocation4], 0  ;;  %s121_s6 = smov [#allocation2]   ;;  %s73_s10 = scalar_lea.hbm %s159_s0, 256 }
   0x2   :  { %s13_s7 = sshll.u32 %s121_s6, 4  ;;  %p74_p0 = scmp.ne.s32.totalorder %s159_s0, %s73_s10  ;;  %s14_s7 = int_to_ptr.vmem [resolvable:$true] %s13_s7 }
   0x3   :  { %p77_p1 = scmp.lt.u32.totalorder %s73_s10, %s159_s0 }
   0x5   :  { %p79_p2 = pnand %p77_p1, %p74_p0 }
   0x7   :  { %82 = shalt.err (!%p79_p2)
}
   0x8   :  { %s83_s15 = scalar_lea.vmem %s14_s7, 256  ;;  %p88_p4 = scmp.lt.s32.totalorder %s14_s7, %s14_s7 }
   0x9   :  { %p84_p3 = scmp.ne.s32.totalorder %s14_s7, %s83_s15  ;;  %p89_p5 = scmp.lt.s32.totalorder %s83_s15, %s83_s15 }
   0xb   :  { %p90_p6 = por %p89_p5, %p88_p4 }
   0xd   :  { %p91_p7 = pnand %p90_p6, %p84_p3 }
   0xf   :  { %94 = shalt.err (!%p91_p7)
}
  0x10   :  { %s122_s16 = smov 128   ;;  %s123_s17 = smov 8  }
  0x11   :  { %19 = dma.hbm_to_vmem [thread:$0]  %s159_s0, 256, %s14_s7, [#allocation3], %s122_s16, %s122_s16, %s123_s17  }
  0x12   :  { %117 = dma.done.wait [#allocation3], 256  }
  0x13   :  { %118 = vsyncadd [#allocation3], 4294967040  ;;  %v23_v0 = vld [vmem:[#allocation2] sm:$0xff]  ;;  %v25_v1 = vld [vmem:[#allocation2 + $0x8] sm:$0xff]  ;;  %s124_s0 = smov [#allocation5]  }
  0x14   :  { %v26_v2 = vadd.f32 %v25_v1, %v23_v0  ;;  %s52_s20 = sshll.u32 %s124_s0, 4  ;;  %s53_s20 = int_to_ptr.vmem [resolvable:$true] %s52_s20 }
  0x15   :  { %s95_s21 = scalar_lea.vmem %s53_s20, 128  ;;  %p100_p9 = scmp.lt.s32.totalorder %s53_s20, %s53_s20 }
  0x16   :  { %v27_v3 = vmul.f32 100.0, %v26_v2  ;;  %p96_p8 = scmp.ne.s32.totalorder %s53_s20, %s95_s21  ;;  %p101_p10 = scmp.lt.s32.totalorder %s95_s21, %s95_s21 }
  0x18   :  { %v61_v4 = vadd.f32 -50.0, %v27_v3  ;;  %v33_v5 = vsub.f32 150.0, %v27_v3  ;;  %p102_p11 = por %p101_p10, %p100_p9 }
  0x1a   :  { %v29_v6 = vmul.f32 0.5, %v61_v4  ;;  %v34_v7 = vmul.f32 0.5, %v33_v5  ;;  %p103_p12 = pnand %p102_p11, %p96_p8 }
  0x1c   :  { %67 = vtanh.f32 %v29_v6 }
  0x1d   :  { %69 = vtanh.f32 %v34_v7 }
  0x26   :  { %v68_v8 = vpop.eup %67 }
  0x27   :  { %v70_v9 = vpop.eup %69  ;;  %v31_v10 = vmul.f32 0.5, %v68_v8 }
  0x28   :  { %v36_v11 = vmul.f32 0.5, %v70_v9 }
  0x29   :  { %v32_v12 = vadd.f32 0.5, %v31_v10 }
  0x2a   :  { %v37_v13 = vadd.f32 0.5, %v36_v11 }
  0x2c   :  { %v38_v14 = vadd.f32 %v37_v13, %v32_v12 }
  0x2e   :  { %v39_v15 = vmul.f32 100.0, %v38_v14 }
  0x30   :  { %v62_v16 = vadd.f32 -150.0, %v39_v15 }
  0x32   :  { %v41_v17 = vmul.f32 0.5, %v62_v16 }
  0x34   :  { %71 = vtanh.f32 %v41_v17 }
  0x3e   :  { %v72_v18 = vpop.eup %71 }
  0x3f   :  { %v43_v19 = vmul.f32 0.5, %v72_v18 }
  0x41   :  { %v44_v20 = vadd.f32 0.5, %v43_v19 }
  0x43   :  { %45 = vst [vmem:[#allocation5] sm:$0xff] %v44_v20 }
  0x44   :  { %106 = shalt.err (!%p103_p12)
}
  0x45   :  { %s107_s24 = scalar_lea.hbm %s160_s1, 128 }
  0x46   :  { %p108_p13 = scmp.ne.s32.totalorder %s160_s1, %s107_s24  ;;  %p111_p0 = scmp.lt.u32.totalorder %s107_s24, %s160_s1 }
  0x48   :  { %p113_p1 = pnand %p111_p0, %p108_p13 }
  0x4a   :  { %116 = shalt.err (!%p113_p1)
}
  0x4b   :  { %55 = dma.vmem_to_hbm [thread:$0]  %s53_s20, 128, %s160_s1, [#allocation4]  }
  0x4c   :  { %119 = dma.done.wait [#allocation4], 128  }
  0x4d   :  { %120 = vsyncadd [#allocation4], 4294967168 }
  0x4e   :  { %59 = vsyncpa [#allocation3], 1 }
  0x4f   :  { %60 = vsyncpa [#allocation4], 1 }

</bundles_post_ra>
